<compile_context>
chip_gen: v7x
topology: tpu7x:2x2x1
jax: 0.10.0
libtpu: 0.0.40
codegen_flags: <defaults>
</compile_context>

<pallas_src>
import functools

import jax
import jax.numpy as jnp
from jax.experimental import pallas as pl
from jax.experimental.pallas import tpu as pltpu


def _mha_kernel(x_ref, wqkv_ref, bqkv_ref, wo_ref, bo_ref, mask_ref, out_ref,
                q_s, k_s, v_s, *, heads, dh, H, TQ, inv_scaler, compute_dtype):
    t = pl.program_id(1)

    # ------------------------------------------------------------------
    # Compute Q/K/V for the whole sequence once per batch element (first
    # query tile) and keep them resident in VMEM scratch across tiles.
    # ------------------------------------------------------------------
    @pl.when(t == 0)
    def _():
        xv = x_ref[0]                                          # (L, H) bf16
        qkv = jnp.dot(xv, wqkv_ref[...],
                      preferred_element_type=jnp.float32)      # (L, 3H) f32
        qkv = qkv + bqkv_ref[...]
        # Fold 1/sqrt(dh) into Q once.
        q_s[...] = (qkv[:, 0 * H:1 * H] * inv_scaler).astype(compute_dtype)
        k_s[...] = qkv[:, 1 * H:2 * H].astype(compute_dtype)
        v_s[...] = qkv[:, 2 * H:3 * H].astype(compute_dtype)

    # Additive attention bias shared by all heads / all query rows: (1, L).
    bias = mask_ref[0].astype(jnp.float32) * (-10000.0)

    # Query tile for this grid step (already scaled).
    qoff = pl.multiple_of(t * TQ, TQ)
    q_tile = q_s[pl.ds(qoff, TQ), :]                           # (TQ, H)

    # Hoisted loads; slice values (not refs) per head.
    k_all = k_s[...]                                           # (L, H)
    v_all = v_s[...]                                           # (L, H)
    wo_all = wo_ref[...]                                       # (H, H)

    acc = jnp.zeros((TQ, H), jnp.float32)
    for h in range(heads):                                     # static unroll, heads is small
        sl = slice(h * dh, (h + 1) * dh)
        qh = q_tile[:, sl]                                     # (TQ, dh)
        kh = k_all[:, sl]                                      # (L,  dh)
        vh = v_all[:, sl]                                      # (L,  dh)

        # scores = (q / sqrt(dh)) @ k^T  + mask * -10000   (no transpose op)
        s = jax.lax.dot_general(qh, kh, (((1,), (1,)), ((), ())),
                                preferred_element_type=jnp.float32)  # (TQ, L)
        s = s + bias

        # Softmax in f32.
        s = s - jnp.max(s, axis=-1, keepdims=True)
        e = jnp.exp(s)
        p = e * pl.reciprocal(jnp.sum(e, axis=-1, keepdims=True), approx=True)

        # TODO(synk): attention dropout (nn.Dropout) is identity in eval mode;
        # training-time dropout is not applied here.

        ctx_h = jnp.dot(p.astype(compute_dtype), vh,
                        preferred_element_type=jnp.float32)     # (TQ, dh)
        # Fused output projection: avoids lane concat + epilogue matmul.
        acc = acc + jnp.dot(ctx_h.astype(compute_dtype), wo_all[sl, :],
                            preferred_element_type=jnp.float32)  # (TQ, H)

    out_ref[0] = (acc + bo_ref[...]).astype(out_ref.dtype)


def prepare_params(params, *, compute_dtype=jnp.bfloat16):
    """One-time prep (outside the per-call path): pack QKV, transpose to (in, out)."""
    H = params["wq"].shape[0]
    wqkv = jnp.concatenate(
        [params["wq"].T, params["wk"].T, params["wv"].T], axis=1
    ).astype(compute_dtype)                                    # (H, 3H)
    bqkv = jnp.concatenate(
        [params["bq"], params["bk"], params["bv"]]
    ).reshape(1, 3 * H).astype(jnp.float32)                    # (1, 3H)
    wo = params["wo"].T.astype(compute_dtype)                  # (H, H)
    bo = params["bo"].reshape(1, H).astype(jnp.float32)        # (1, H)
    return {"wqkv": wqkv, "bqkv": bqkv, "wo": wo, "bo": bo}


def _pick_tq(L, max_tq=128):
    if L <= max_tq:
        return L
    for tq in (128, 64, 32, 16, 8):
        if L % tq == 0:
            return tq
    return L


def multi_head_attention(x, mask, prepared, *, heads,
                         compute_dtype=jnp.bfloat16, out_dtype=jnp.float32):
    """x: (bs, L, H); mask: broadcastable key mask, e.g. (bs, 1, 1, L), 1.0 = masked."""
    bs, L, H = x.shape
    dh = H // heads
    assert dh * heads == H
    inv_scaler = 1.0 / (float(dh) ** 0.5)

    TQ = _pick_tq(L)
    assert L % TQ == 0
    n_qt = L // TQ

    # Key-axis additive mask only (standard BERT (bs, 1, 1, L) shape).
    assert mask.size == bs * L, "mask must be broadcastable along the key axis"
    mask_key = mask.reshape(bs, 1, L).astype(jnp.float32)

    x_c = x.astype(compute_dtype)

    kernel = functools.partial(
        _mha_kernel, heads=heads, dh=dh, H=H, TQ=TQ,
        inv_scaler=inv_scaler, compute_dtype=compute_dtype)

    return pl.pallas_call(
        kernel,
        out_shape=jax.ShapeDtypeStruct((bs, L, H), out_dtype),
        grid_spec=pltpu.PrefetchScalarGridSpec(
            num_scalar_prefetch=0,
            grid=(bs, n_qt),
            in_specs=[
                pl.BlockSpec((1, L, H), lambda b, t: (b, 0, 0)),     # x (full seq; re-DMA'd only when b changes)
                pl.BlockSpec((H, 3 * H), lambda b, t: (0, 0)),       # fused QKV weight
                pl.BlockSpec((1, 3 * H), lambda b, t: (0, 0)),       # fused QKV bias
                pl.BlockSpec((H, H), lambda b, t: (0, 0)),           # output weight
                pl.BlockSpec((1, H), lambda b, t: (0, 0)),           # output bias
                pl.BlockSpec((1, 1, L), lambda b, t: (b, 0, 0)),     # key mask
            ],
            out_specs=pl.BlockSpec((1, TQ, H), lambda b, t: (b, t, 0)),
            scratch_shapes=[
                pltpu.VMEM((L, H), compute_dtype),   # Q (pre-scaled), whole sequence
                pltpu.VMEM((L, H), compute_dtype),   # K
                pltpu.VMEM((L, H), compute_dtype),   # V
            ],
        ),
        compiler_params=pltpu.CompilerParams(
            dimension_semantics=("parallel", "arbitrary")),
    )(x_c, prepared["wqkv"], prepared["bqkv"], prepared["wo"], prepared["bo"],
      mask_key)


def _reference(x, mask, params, *, heads):
    bs, L, H = x.shape
    dh = H // heads
    q = x @ params["wq"].T + params["bq"]
    k = x @ params["wk"].T + params["bk"]
    v = x @ params["wv"].T + params["bv"]
    q = q.reshape(bs, L, heads, dh).transpose(0, 2, 1, 3)
    k = k.reshape(bs, L, heads, dh).transpose(0, 2, 3, 1)
    v = v.reshape(bs, L, heads, dh).transpose(0, 2, 1, 3)
    s = jnp.matmul(q, k) / (dh ** 0.5)
    s = s + mask * (-10000.0)
    p = jax.nn.softmax(s, axis=-1)
    ctx = jnp.matmul(p, v).transpose(0, 2, 1, 3).reshape(bs, L, H)
    return ctx @ params["wo"].T + params["bo"]


if __name__ == "__main__":
    bs, L, H, heads = 2, 8, 32, 4

    key = jax.random.PRNGKey(0)
    keys = jax.random.split(key, 10)
    scale = 1.0 / (H ** 0.5)
    params = {
        "wq": jax.random.normal(keys[0], (H, H), jnp.float32) * scale,
        "bq": jax.random.normal(keys[1], (H,), jnp.float32) * 0.01,
        "wk": jax.random.normal(keys[2], (H, H), jnp.float32) * scale,
        "bk": jax.random.normal(keys[3], (H,), jnp.float32) * 0.01,
        "wv": jax.random.normal(keys[4], (H, H), jnp.float32) * scale,
        "bv": jax.random.normal(keys[5], (H,), jnp.float32) * 0.01,
        "wo": jax.random.normal(keys[6], (H, H), jnp.float32) * scale,
        "bo": jax.random.normal(keys[7], (H,), jnp.float32) * 0.01,
    }

    x = jax.random.normal(keys[8], (bs, L, H), jnp.float32)
    # mask: (bs, 1, 1, L); 1.0 marks positions to suppress (adds -10000).
    mask = jnp.zeros((bs, 1, 1, L), jnp.float32)
    mask = mask.at[1, 0, 0, -2:].set(1.0)

    prepared = prepare_params(params)
    out = multi_head_attention(x, mask, prepared, heads=heads)
    out = jax.block_until_ready(out)

    ref = _reference(x, mask, params, heads=heads)
    # bf16 matmul inputs + approx reciprocal -> looser tolerance than pure f32.
    assert jnp.allclose(out, ref, atol=5e-2, rtol=5e-2), "mismatch vs reference"

    print("KERNEL_OK")
</pallas_src>

<mosaic_0001>
module attributes {stable_mosaic.version = 11 : i64} {
  func.func @_mha_kernel(%arg0: i32, %arg1: i32, %arg2: memref<1x8x32xbf16, #tpu.memory_space<vmem>>, %arg3: memref<32x96xbf16, #tpu.memory_space<vmem>>, %arg4: memref<1x96xf32, #tpu.memory_space<vmem>>, %arg5: memref<32x32xbf16, #tpu.memory_space<vmem>>, %arg6: memref<1x32xf32, #tpu.memory_space<vmem>>, %arg7: memref<1x1x8xf32, #tpu.memory_space<vmem>>, %arg8: memref<1x8x32xf32, #tpu.memory_space<vmem>>, %arg9: memref<8x32xbf16, #tpu.memory_space<vmem>>, %arg10: memref<8x32xbf16, #tpu.memory_space<vmem>>, %arg11: memref<8x32xbf16, #tpu.memory_space<vmem>>) attributes {dimension_semantics = [#tpu.dimension_semantics<parallel>, #tpu.dimension_semantics<arbitrary>], iteration_bounds = array<i64: 2, 1>, scalar_prefetch = 0 : i64, scratch_operands = 3 : i64, tpu.core_type = #tpu.core_type<tc>, window_params = [{transform_indices = @transform_0, window_bounds = array<i64: 1, 8, 32>}, {pipeline_mode = #tpu.pipeline_mode<synchronous>, transform_indices = @transform_1, window_bounds = array<i64: 32, 96>}, {pipeline_mode = #tpu.pipeline_mode<synchronous>, transform_indices = @transform_2, window_bounds = array<i64: 1, 96>}, {pipeline_mode = #tpu.pipeline_mode<synchronous>, transform_indices = @transform_3, window_bounds = array<i64: 32, 32>}, {pipeline_mode = #tpu.pipeline_mode<synchronous>, transform_indices = @transform_4, window_bounds = array<i64: 1, 32>}, {transform_indices = @transform_5, window_bounds = array<i64: 1, 1, 8>}, {transform_indices = @transform_6, window_bounds = array<i64: 1, 8, 32>}]} {
    %c0_i32 = arith.constant 0 : i32
    %0 = arith.cmpi eq, %arg1, %c0_i32 : i32
    %1 = arith.extui %0 : i1 to i32
    %c0_i32_0 = arith.constant 0 : i32
    %2 = arith.cmpi ne, %1, %c0_i32_0 : i32
    scf.if %2 {
      %c0_36 = arith.constant 0 : index
      %c0_37 = arith.constant 0 : index
      %c0_38 = arith.constant 0 : index
      %109 = vector.load %arg2[%c0_36, %c0_37, %c0_38] : memref<1x8x32xbf16, #tpu.memory_space<vmem>>, vector<1x8x32xbf16>
      %110 = vector.shape_cast %109 : vector<1x8x32xbf16> to vector<8x32xbf16>
      %c0_39 = arith.constant 0 : index
      %c0_40 = arith.constant 0 : index
      %111 = vector.load %arg3[%c0_39, %c0_40] : memref<32x96xbf16, #tpu.memory_space<vmem>>, vector<32x96xbf16>
      %cst_41 = arith.constant dense<0.000000e+00> : vector<8x96xf32>
      %112 = tpu.matmul %110, %111, %cst_41 {dimension_numbers = #tpu.dot_dimension_numbers<[1], [0], [0], [1], [0, 0, 1, 1], [], []>} : vector<8x32xbf16>, vector<32x96xbf16>, vector<8x96xf32> -> vector<8x96xf32>
      %c0_42 = arith.constant 0 : index
      %c0_43 = arith.constant 0 : index
      %113 = vector.load %arg4[%c0_42, %c0_43] : memref<1x96xf32, #tpu.memory_space<vmem>>, vector<1x96xf32>
      %114 = vector.broadcast %113 : vector<1x96xf32> to vector<8x96xf32>
      %115 = arith.addf %112, %114 : vector<8x96xf32>
      %116 = vector.extract_strided_slice %115 {offsets = [0, 0], sizes = [8, 32], strides = [1, 1]} : vector<8x96xf32> to vector<8x32xf32>
      %cst_44 = arith.constant 0.353553385 : f32
      %117 = vector.broadcast %cst_44 : f32 to vector<8x32xf32>
      %118 = arith.mulf %116, %117 : vector<8x32xf32>
      %119 = arith.truncf %118 : vector<8x32xf32> to vector<8x32xbf16>
      %c0_45 = arith.constant 0 : index
      %c0_46 = arith.constant 0 : index
      %120 = vector.load %arg9[%c0_45, %c0_46] : memref<8x32xbf16, #tpu.memory_space<vmem>>, vector<8x32xbf16>
      tpu.vector_store %arg9[%c0_45, %c0_46], %119 {strides = array<i32>} : memref<8x32xbf16, #tpu.memory_space<vmem>>, vector<8x32xbf16>,
      %121 = vector.extract_strided_slice %115 {offsets = [0, 32], sizes = [8, 32], strides = [1, 1]} : vector<8x96xf32> to vector<8x32xf32>
      %122 = arith.truncf %121 : vector<8x32xf32> to vector<8x32xbf16>
      %c0_47 = arith.constant 0 : index
      %c0_48 = arith.constant 0 : index
      %123 = vector.load %arg10[%c0_47, %c0_48] : memref<8x32xbf16, #tpu.memory_space<vmem>>, vector<8x32xbf16>
      tpu.vector_store %arg10[%c0_47, %c0_48], %122 {strides = array<i32>} : memref<8x32xbf16, #tpu.memory_space<vmem>>, vector<8x32xbf16>,
      %124 = vector.extract_strided_slice %115 {offsets = [0, 64], sizes = [8, 32], strides = [1, 1]} : vector<8x96xf32> to vector<8x32xf32>
      %125 = arith.truncf %124 : vector<8x32xf32> to vector<8x32xbf16>
      %c0_49 = arith.constant 0 : index
      %c0_50 = arith.constant 0 : index
      %126 = vector.load %arg11[%c0_49, %c0_50] : memref<8x32xbf16, #tpu.memory_space<vmem>>, vector<8x32xbf16>
      tpu.vector_store %arg11[%c0_49, %c0_50], %125 {strides = array<i32>} : memref<8x32xbf16, #tpu.memory_space<vmem>>, vector<8x32xbf16>,
    } else {
    }
    %c0 = arith.constant 0 : index
    %c0_1 = arith.constant 0 : index
    %c0_2 = arith.constant 0 : index
    %3 = vector.load %arg7[%c0, %c0_1, %c0_2] : memref<1x1x8xf32, #tpu.memory_space<vmem>>, vector<1x1x8xf32>
    %4 = vector.shape_cast %3 : vector<1x1x8xf32> to vector<1x8xf32>
    %cst = arith.constant -1.000000e+04 : f32
    %5 = vector.broadcast %cst : f32 to vector<1x8xf32>
    %6 = arith.mulf %4, %5 : vector<1x8xf32>
    %c8_i32 = arith.constant 8 : i32
    %7 = arith.muli %arg1, %c8_i32 : i32
    %8 = tpu.assume_multiple %7, 8 : i32
    %9 = arith.index_cast %8 : i32 to index
    %c0_3 = arith.constant 0 : index
    %10 = vector.load %arg9[%9, %c0_3] : memref<8x32xbf16, #tpu.memory_space<vmem>>, vector<8x32xbf16>
    %c0_4 = arith.constant 0 : index
    %c0_5 = arith.constant 0 : index
    %11 = vector.load %arg10[%c0_4, %c0_5] : memref<8x32xbf16, #tpu.memory_space<vmem>>, vector<8x32xbf16>
    %c0_6 = arith.constant 0 : index
    %c0_7 = arith.constant 0 : index
    %12 = vector.load %arg11[%c0_6, %c0_7] : memref<8x32xbf16, #tpu.memory_space<vmem>>, vector<8x32xbf16>
    %c0_8 = arith.constant 0 : index
    %c0_9 = arith.constant 0 : index
    %13 = vector.load %arg5[%c0_8, %c0_9] : memref<32x32xbf16, #tpu.memory_space<vmem>>, vector<32x32xbf16>
    %cst_10 = arith.constant 0.000000e+00 : f32
    %14 = vector.broadcast %cst_10 : f32 to vector<8x32xf32>
    %15 = vector.extract_strided_slice %10 {offsets = [0, 0], sizes = [8, 8], strides = [1, 1]} : vector<8x32xbf16> to vector<8x8xbf16>
    %16 = vector.extract_strided_slice %11 {offsets = [0, 0], sizes = [8, 8], strides = [1, 1]} : vector<8x32xbf16> to vector<8x8xbf16>
    %17 = vector.extract_strided_slice %12 {offsets = [0, 0], sizes = [8, 8], strides = [1, 1]} : vector<8x32xbf16> to vector<8x8xbf16>
    %cst_11 = arith.constant dense<0.000000e+00> : vector<8x8xf32>
    %18 = tpu.matmul %15, %16, %cst_11 {dimension_numbers = #tpu.dot_dimension_numbers<[1], [1], [0], [0], [0, 0, 1, 0], [], []>} : vector<8x8xbf16>, vector<8x8xbf16>, vector<8x8xf32> -> vector<8x8xf32>
    %19 = vector.broadcast %6 : vector<1x8xf32> to vector<8x8xf32>
    %20 = arith.addf %18, %19 : vector<8x8xf32>
    %cst_12 = arith.constant dense<0xFF800000> : vector<8xf32>
    %21 = vector.multi_reduction <maximumf>, %20, %cst_12 [1] : vector<8x8xf32> to vector<8xf32>
    %22 = vector.shape_cast %21 : vector<8xf32> to vector<8x1xf32>
    %23 = vector.broadcast %22 : vector<8x1xf32> to vector<8x8xf32>
    %24 = arith.subf %20, %23 : vector<8x8xf32>
    %25 = math.exp %24 : vector<8x8xf32>
    %cst_13 = arith.constant dense<0.000000e+00> : vector<8xf32>
    %26 = vector.multi_reduction <add>, %25, %cst_13 [1] : vector<8x8xf32> to vector<8xf32>
    %27 = vector.shape_cast %26 : vector<8xf32> to vector<8x1xf32>
    %28 = tpu.reciprocal %27 {approx = true} : vector<8x1xf32> -> vector<8x1xf32>
    %29 = vector.broadcast %28 : vector<8x1xf32> to vector<8x8xf32>
    %30 = arith.mulf %25, %29 : vector<8x8xf32>
    %31 = arith.truncf %30 : vector<8x8xf32> to vector<8x8xbf16>
    %cst_14 = arith.constant dense<0.000000e+00> : vector<8x8xf32>
    %32 = tpu.matmul %31, %17, %cst_14 {dimension_numbers = #tpu.dot_dimension_numbers<[1], [0], [0], [1], [0, 0, 1, 1], [], []>} : vector<8x8xbf16>, vector<8x8xbf16>, vector<8x8xf32> -> vector<8x8xf32>
    %33 = arith.truncf %32 : vector<8x8xf32> to vector<8x8xbf16>
    %34 = vector.extract_strided_slice %13 {offsets = [0, 0], sizes = [8, 32], strides = [1, 1]} : vector<32x32xbf16> to vector<8x32xbf16>
    %cst_15 = arith.constant dense<0.000000e+00> : vector<8x32xf32>
    %35 = tpu.matmul %33, %34, %cst_15 {dimension_numbers = #tpu.dot_dimension_numbers<[1], [0], [0], [1], [0, 0, 1, 1], [], []>} : vector<8x8xbf16>, vector<8x32xbf16>, vector<8x32xf32> -> vector<8x32xf32>
    %36 = arith.addf %14, %35 : vector<8x32xf32>
    %37 = vector.extract_strided_slice %10 {offsets = [0, 8], sizes = [8, 8], strides = [1, 1]} : vector<8x32xbf16> to vector<8x8xbf16>
    %38 = vector.extract_strided_slice %11 {offsets = [0, 8], sizes = [8, 8], strides = [1, 1]} : vector<8x32xbf16> to vector<8x8xbf16>
    %39 = vector.extract_strided_slice %12 {offsets = [0, 8], sizes = [8, 8], strides = [1, 1]} : vector<8x32xbf16> to vector<8x8xbf16>
    %cst_16 = arith.constant dense<0.000000e+00> : vector<8x8xf32>
    %40 = tpu.matmul %37, %38, %cst_16 {dimension_numbers = #tpu.dot_dimension_numbers<[1], [1], [0], [0], [0, 0, 1, 0], [], []>} : vector<8x8xbf16>, vector<8x8xbf16>, vector<8x8xf32> -> vector<8x8xf32>
    %41 = vector.broadcast %6 : vector<1x8xf32> to vector<8x8xf32>
    %42 = arith.addf %40, %41 : vector<8x8xf32>
    %cst_17 = arith.constant dense<0xFF800000> : vector<8xf32>
    %43 = vector.multi_reduction <maximumf>, %42, %cst_17 [1] : vector<8x8xf32> to vector<8xf32>
    %44 = vector.shape_cast %43 : vector<8xf32> to vector<8x1xf32>
    %45 = vector.broadcast %44 : vector<8x1xf32> to vector<8x8xf32>
    %46 = arith.subf %42, %45 : vector<8x8xf32>
    %47 = math.exp %46 : vector<8x8xf32>
    %cst_18 = arith.constant dense<0.000000e+00> : vector<8xf32>
    %48 = vector.multi_reduction <add>, %47, %cst_18 [1] : vector<8x8xf32> to vector<8xf32>
    %49 = vector.shape_cast %48 : vector<8xf32> to vector<8x1xf32>
    %50 = tpu.reciprocal %49 {approx = true} : vector<8x1xf32> -> vector<8x1xf32>
    %51 = vector.broadcast %50 : vector<8x1xf32> to vector<8x8xf32>
    %52 = arith.mulf %47, %51 : vector<8x8xf32>
    %53 = arith.truncf %52 : vector<8x8xf32> to vector<8x8xbf16>
    %cst_19 = arith.constant dense<0.000000e+00> : vector<8x8xf32>
    %54 = tpu.matmul %53, %39, %cst_19 {dimension_numbers = #tpu.dot_dimension_numbers<[1], [0], [0], [1], [0, 0, 1, 1], [], []>} : vector<8x8xbf16>, vector<8x8xbf16>, vector<8x8xf32> -> vector<8x8xf32>
    %55 = arith.truncf %54 : vector<8x8xf32> to vector<8x8xbf16>
    %56 = vector.extract_strided_slice %13 {offsets = [8, 0], sizes = [8, 32], strides = [1, 1]} : vector<32x32xbf16> to vector<8x32xbf16>
    %cst_20 = arith.constant dense<0.000000e+00> : vector<8x32xf32>
    %57 = tpu.matmul %55, %56, %cst_20 {dimension_numbers = #tpu.dot_dimension_numbers<[1], [0], [0], [1], [0, 0, 1, 1], [], []>} : vector<8x8xbf16>, vector<8x32xbf16>, vector<8x32xf32> -> vector<8x32xf32>
    %58 = arith.addf %36, %57 : vector<8x32xf32>
    %59 = vector.extract_strided_slice %10 {offsets = [0, 16], sizes = [8, 8], strides = [1, 1]} : vector<8x32xbf16> to vector<8x8xbf16>
    %60 = vector.extract_strided_slice %11 {offsets = [0, 16], sizes = [8, 8], strides = [1, 1]} : vector<8x32xbf16> to vector<8x8xbf16>
    %61 = vector.extract_strided_slice %12 {offsets = [0, 16], sizes = [8, 8], strides = [1, 1]} : vector<8x32xbf16> to vector<8x8xbf16>
    %cst_21 = arith.constant dense<0.000000e+00> : vector<8x8xf32>
    %62 = tpu.matmul %59, %60, %cst_21 {dimension_numbers = #tpu.dot_dimension_numbers<[1], [1], [0], [0], [0, 0, 1, 0], [], []>} : vector<8x8xbf16>, vector<8x8xbf16>, vector<8x8xf32> -> vector<8x8xf32>
    %63 = vector.broadcast %6 : vector<1x8xf32> to vector<8x8xf32>
    %64 = arith.addf %62, %63 : vector<8x8xf32>
    %cst_22 = arith.constant dense<0xFF800000> : vector<8xf32>
    %65 = vector.multi_reduction <maximumf>, %64, %cst_22 [1] : vector<8x8xf32> to vector<8xf32>
    %66 = vector.shape_cast %65 : vector<8xf32> to vector<8x1xf32>
    %67 = vector.broadcast %66 : vector<8x1xf32> to vector<8x8xf32>
    %68 = arith.subf %64, %67 : vector<8x8xf32>
    %69 = math.exp %68 : vector<8x8xf32>
    %cst_23 = arith.constant dense<0.000000e+00> : vector<8xf32>
    %70 = vector.multi_reduction <add>, %69, %cst_23 [1] : vector<8x8xf32> to vector<8xf32>
    %71 = vector.shape_cast %70 : vector<8xf32> to vector<8x1xf32>
    %72 = tpu.reciprocal %71 {approx = true} : vector<8x1xf32> -> vector<8x1xf32>
    %73 = vector.broadcast %72 : vector<8x1xf32> to vector<8x8xf32>
    %74 = arith.mulf %69, %73 : vector<8x8xf32>
    %75 = arith.truncf %74 : vector<8x8xf32> to vector<8x8xbf16>
    %cst_24 = arith.constant dense<0.000000e+00> : vector<8x8xf32>
    %76 = tpu.matmul %75, %61, %cst_24 {dimension_numbers = #tpu.dot_dimension_numbers<[1], [0], [0], [1], [0, 0, 1, 1], [], []>} : vector<8x8xbf16>, vector<8x8xbf16>, vector<8x8xf32> -> vector<8x8xf32>
    %77 = arith.truncf %76 : vector<8x8xf32> to vector<8x8xbf16>
    %78 = vector.extract_strided_slice %13 {offsets = [16, 0], sizes = [8, 32], strides = [1, 1]} : vector<32x32xbf16> to vector<8x32xbf16>
    %cst_25 = arith.constant dense<0.000000e+00> : vector<8x32xf32>
    %79 = tpu.matmul %77, %78, %cst_25 {dimension_numbers = #tpu.dot_dimension_numbers<[1], [0], [0], [1], [0, 0, 1, 1], [], []>} : vector<8x8xbf16>, vector<8x32xbf16>, vector<8x32xf32> -> vector<8x32xf32>
    %80 = arith.addf %58, %79 : vector<8x32xf32>
    %81 = vector.extract_strided_slice %10 {offsets = [0, 24], sizes = [8, 8], strides = [1, 1]} : vector<8x32xbf16> to vector<8x8xbf16>
    %82 = vector.extract_strided_slice %11 {offsets = [0, 24], sizes = [8, 8], strides = [1, 1]} : vector<8x32xbf16> to vector<8x8xbf16>
    %83 = vector.extract_strided_slice %12 {offsets = [0, 24], sizes = [8, 8], strides = [1, 1]} : vector<8x32xbf16> to vector<8x8xbf16>
    %cst_26 = arith.constant dense<0.000000e+00> : vector<8x8xf32>
    %84 = tpu.matmul %81, %82, %cst_26 {dimension_numbers = #tpu.dot_dimension_numbers<[1], [1], [0], [0], [0, 0, 1, 0], [], []>} : vector<8x8xbf16>, vector<8x8xbf16>, vector<8x8xf32> -> vector<8x8xf32>
    %85 = vector.broadcast %6 : vector<1x8xf32> to vector<8x8xf32>
    %86 = arith.addf %84, %85 : vector<8x8xf32>
    %cst_27 = arith.constant dense<0xFF800000> : vector<8xf32>
    %87 = vector.multi_reduction <maximumf>, %86, %cst_27 [1] : vector<8x8xf32> to vector<8xf32>
    %88 = vector.shape_cast %87 : vector<8xf32> to vector<8x1xf32>
    %89 = vector.broadcast %88 : vector<8x1xf32> to vector<8x8xf32>
    %90 = arith.subf %86, %89 : vector<8x8xf32>
    %91 = math.exp %90 : vector<8x8xf32>
    %cst_28 = arith.constant dense<0.000000e+00> : vector<8xf32>
    %92 = vector.multi_reduction <add>, %91, %cst_28 [1] : vector<8x8xf32> to vector<8xf32>
    %93 = vector.shape_cast %92 : vector<8xf32> to vector<8x1xf32>
    %94 = tpu.reciprocal %93 {approx = true} : vector<8x1xf32> -> vector<8x1xf32>
    %95 = vector.broadcast %94 : vector<8x1xf32> to vector<8x8xf32>
    %96 = arith.mulf %91, %95 : vector<8x8xf32>
    %97 = arith.truncf %96 : vector<8x8xf32> to vector<8x8xbf16>
    %cst_29 = arith.constant dense<0.000000e+00> : vector<8x8xf32>
    %98 = tpu.matmul %97, %83, %cst_29 {dimension_numbers = #tpu.dot_dimension_numbers<[1], [0], [0], [1], [0, 0, 1, 1], [], []>} : vector<8x8xbf16>, vector<8x8xbf16>, vector<8x8xf32> -> vector<8x8xf32>
    %99 = arith.truncf %98 : vector<8x8xf32> to vector<8x8xbf16>
    %100 = vector.extract_strided_slice %13 {offsets = [24, 0], sizes = [8, 32], strides = [1, 1]} : vector<32x32xbf16> to vector<8x32xbf16>
    %cst_30 = arith.constant dense<0.000000e+00> : vector<8x32xf32>
    %101 = tpu.matmul %99, %100, %cst_30 {dimension_numbers = #tpu.dot_dimension_numbers<[1], [0], [0], [1], [0, 0, 1, 1], [], []>} : vector<8x8xbf16>, vector<8x32xbf16>, vector<8x32xf32> -> vector<8x32xf32>
    %102 = arith.addf %80, %101 : vector<8x32xf32>
    %c0_31 = arith.constant 0 : index
    %c0_32 = arith.constant 0 : index
    %103 = vector.load %arg6[%c0_31, %c0_32] : memref<1x32xf32, #tpu.memory_space<vmem>>, vector<1x32xf32>
    %104 = vector.broadcast %103 : vector<1x32xf32> to vector<8x32xf32>
    %105 = arith.addf %102, %104 : vector<8x32xf32>
    %c0_33 = arith.constant 0 : index
    %c0_34 = arith.constant 0 : index
    %c0_35 = arith.constant 0 : index
    %106 = vector.load %arg8[%c0_33, %c0_34, %c0_35] : memref<1x8x32xf32, #tpu.memory_space<vmem>>, vector<1x8x32xf32>
    %107 = vector.shape_cast %106 : vector<1x8x32xf32> to vector<8x32xf32>
    %108 = vector.shape_cast %105 : vector<8x32xf32> to vector<1x8x32xf32>
    tpu.vector_store %arg8[%c0_33, %c0_34, %c0_35], %108 {strides = array<i32>} : memref<1x8x32xf32, #tpu.memory_space<vmem>>, vector<1x8x32xf32>,
    return
  }
  func.func @transform_0(%arg0: i32, %arg1: i32) -> (i32, i32, i32) {
    %c0_i32 = arith.constant 0 : i32
    %c0_i32_0 = arith.constant 0 : i32
    %c0_i32_1 = arith.constant 0 : i32
    return %arg0, %c0_i32, %c0_i32_0 : i32, i32, i32
  }
  func.func @transform_1(%arg0: i32, %arg1: i32) -> (i32, i32) {
    %c0_i32 = arith.constant 0 : i32
    %c0_i32_0 = arith.constant 0 : i32
    %c0_i32_1 = arith.constant 0 : i32
    return %c0_i32, %c0_i32_0 : i32, i32
  }
  func.func @transform_2(%arg0: i32, %arg1: i32) -> (i32, i32) {
    %c0_i32 = arith.constant 0 : i32
    %c0_i32_0 = arith.constant 0 : i32
    %c0_i32_1 = arith.constant 0 : i32
    return %c0_i32, %c0_i32_0 : i32, i32
  }
  func.func @transform_3(%arg0: i32, %arg1: i32) -> (i32, i32) {
    %c0_i32 = arith.constant 0 : i32
    %c0_i32_0 = arith.constant 0 : i32
    %c0_i32_1 = arith.constant 0 : i32
    return %c0_i32, %c0_i32_0 : i32, i32
  }
  func.func @transform_4(%arg0: i32, %arg1: i32) -> (i32, i32) {
    %c0_i32 = arith.constant 0 : i32
    %c0_i32_0 = arith.constant 0 : i32
    %c0_i32_1 = arith.constant 0 : i32
    return %c0_i32, %c0_i32_0 : i32, i32
  }
  func.func @transform_5(%arg0: i32, %arg1: i32) -> (i32, i32, i32) {
    %c0_i32 = arith.constant 0 : i32
    %c0_i32_0 = arith.constant 0 : i32
    %c0_i32_1 = arith.constant 0 : i32
    return %arg0, %c0_i32, %c0_i32_0 : i32, i32, i32
  }
  func.func @transform_6(%arg0: i32, %arg1: i32) -> (i32, i32, i32) {
    %c0_i32 = arith.constant 0 : i32
    %c0_i32_0 = arith.constant 0 : i32
    return %arg0, %arg1, %c0_i32 : i32, i32, i32
  }
}

</mosaic_0001>

<bundles_post_ra>
// kernel: tpu_custom_call.1
= control target key start
LH: loop header
LB: loop body
LE: loop exit
PB: predicated region body
PF: predicated region fallthrough
CT: control target
= control target key end

     0   :  { %11 = vsyncpa [#allocation6], 0  ;;  %s2055_s0 = inlined_call_operand.hbm [shape: bf16[2,8,32], index: 0, kind: input, shape index: {}]   ;;  %s2056_s1 = inlined_call_operand.hbm [shape: bf16[32,96], index: 1, kind: input, shape index: {}]   ;;  %s2057_s2 = inlined_call_operand.vmem [shape: f32[1,96], index: 2, kind: input, shape index: {}]   ;;  %s2058_s3 = inlined_call_operand.hbm [shape: bf16[32,32], index: 3, kind: input, shape index: {}]   ;;  %s2059_s4 = inlined_call_operand.vmem [shape: f32[1,32], index: 4, kind: input, shape index: {}]   ;;  %s2060_s5 = inlined_call_operand.vmem [shape: f32[2,1,8], index: 5, kind: input, shape index: {}]   ;;  %s2061_s6 = inlined_call_operand.hbm [shape: f32[2,8,32], index: 6, kind: output, shape index: {}]  }
   0x1   :  { %13 = vsyncpa [#allocation6 + $0x1], 0 }
   0x2   :  { %14 = vsyncpa [#allocation9], 0 }
   0x3   :  { %15 = vsyncpa [#allocation7], 0 }
   0x4   :  { %17 = vsyncpa [#allocation7 + $0x1], 0  ;;  %s1683_s21 = smov 0   ;;  %s1685_s22 = smov 0  }
   0x5   :  { %s1687_s23 = smov 0   ;;  %s1689_s24 = smov 0  }
   0x6   :  { %s1691_s25 = smov 0   ;;  %s1693_s26 = smov 0  }
   0x7 LB: > { %s1202_s27 = sadd.s32 4294967295, %s1633_s26   ;;  %s1203_s28 = sadd.s32 4294967294, %s1633_s26   ;;  %s1633_s26 = sphi %s1693_s26, %s23_s26   ;;  %s1629_s25 = sphi %s1691_s25, %s2086_s25   ;;  %s1625_s24 = sphi %s1689_s24, %s2085_s24   ;;  %s1621_s23 = sphi %s1687_s23, %s2084_s23   ;;  %s1617_s22 = sphi %s1685_s22, %s2083_s22   ;;  %s1613_s21 = sphi %s1683_s21, %s2082_s21  }
   0x8   : > { %p55_p0 = scmp.ne.s32.totalorder %s1617_s22, %s1613_s21  ;;  %p1717_p1 = scmp.eq.s32.totalorder %s1202_s27, 0 }
   0x9   : > { %p1721_p2 = scmp.eq.s32.totalorder %s1202_s27, 1  ;;  %p197_p3 = scmp.eq.s32.totalorder %s1203_s28, 1 }
   0xa   : > { %s2067_s29 = scalar_select %p1717_p1, 1, 0 }
   0xb   : > { %p1727_p4 = por %p1717_p1, %p55_p0  ;;  %p1204_p5 = scmp.ge.s32.totalorder %s1633_s26, 1 }
   0xc   : > { %p1732_p6 = por %p197_p3, %p55_p0  ;;  %p204_p7 = scmp.lt.s32.totalorder %s1633_s26, 3 }
   0xd   : > { %s2069_s7 = scalar_select %p1727_p4, 1, 0 }
   0xe   : > { %s2070_s8 = scalar_select %p1732_p6, 1, 0 }
   0xf   : > { %p1737_p8 = pnand %p1204_p5, %p204_p7  ;;  %s1635_s10 = smov [#allocation8]  }
  0x10   : > { %2071 = sst [smem:[#allocation15_spill]] %s2070_s8  ;;  %s216_s11 = sshll.u32 %s1635_s10, 4  ;;  %s1741_s11 = int_to_ptr.vmem [resolvable:$true] %s216_s11 }
  0x11   : > { %p1360_p9 = pneg %p1737_p8  ;;  %s1636_s13 = smov [#allocation10]  }
  0x12   : > { %s232_s14 = sshll.u32 %s1636_s13, 4  ;;  %s1461_s17 = scalar_lea.hbm %s2056_s1, 256  ;;  %s1752_s14 = int_to_ptr.vmem [resolvable:$true] %s232_s14 }
  0x13   : > { %p1748_p11 = pnand %p1360_p9, %p1717_p1  ;;  %p1462_p12 = scmp.ne.s32.totalorder %s2056_s1, %s1461_s17 }
  0x14   : > { %p1468_p5 = scmp.lt.u32.totalorder %s1461_s17, %s2056_s1 }
  0x15   : > { %p1463_p13 = pneg %p1748_p11 }
  0x17   : > { %p1464_p0 = pnand %p1463_p13, %p1462_p12 }
  0x19   : > { %p1465_p3 = pneg %p1464_p0 }
  0x1b   : > { %p1470_p7 = pnand %p1468_p5, %p1465_p3 }
  0x1d   : > { %1473 = shalt.err (!%p1470_p7)
}
  0x1e   : > { %s1474_s28 = scalar_lea.vmem %s1741_s11, 256  ;;  %p1482_p1 = scmp.lt.s32.totalorder %s1741_s11, %s1741_s11 }
  0x1f   : > { %p1475_p9 = scmp.ne.s32.totalorder %s1741_s11, %s1474_s28  ;;  %p1483_p12 = scmp.lt.s32.totalorder %s1474_s28, %s1474_s28 }
  0x21   : > { %p1477_p10 = pnand %p1475_p9, %p1463_p13  ;;  %p1484_p0 = por %p1483_p12, %p1482_p1 }
  0x23   : > { %p1478_p6 = pneg %p1477_p10 }
  0x25   : > { %p1485_p4 = pnand %p1484_p0, %p1478_p6 }
  0x27   : > { %1488 = shalt.err (!%p1485_p4)
}
  0x28   : > { %s1637_s10 = smov 64   ;;  %s1638_s13 = smov 4  }
  0x29   : > { %1363 = dma.hbm_to_vmem [thread:$0]  (!%p1748_p11), %s2056_s1, 256, %s1741_s11, [#allocation9], %s1637_s10, %s1637_s10, %s1638_s13  }
  0x2a   : > { %s1489_s19 = scalar_lea.hbm %s2058_s3, 256 }
  0x2b   : > { %p1490_p1 = scmp.ne.s32.totalorder %s2058_s3, %s1489_s19  ;;  %p1496_p10 = scmp.lt.u32.totalorder %s1489_s19, %s2058_s3 }
  0x2d   : > { %p1492_p4 = pnand %p1490_p1, %p1463_p13 }
  0x2f   : > { %p1493_p6 = pneg %p1492_p4 }
  0x31   : > { %p1498_p3 = pnand %p1496_p10, %p1493_p6 }
  0x33   : > { %1501 = shalt.err (!%p1498_p3)
}
  0x34   : > { %s1502_s11 = scalar_lea.vmem %s1752_s14, 256  ;;  %p1510_p12 = scmp.lt.s32.totalorder %s1752_s14, %s1752_s14 }
  0x35   : > { %p1503_p5 = scmp.ne.s32.totalorder %s1752_s14, %s1502_s11  ;;  %p1511_p0 = scmp.lt.s32.totalorder %s1502_s11, %s1502_s11 }
  0x37   : > { %p1505_p7 = pnand %p1503_p5, %p1463_p13  ;;  %p1512_p1 = por %p1511_p0, %p1510_p12 }
  0x39   : > { %p1506_p9 = pneg %p1505_p7 }
  0x3b   : > { %p1513_p4 = pnand %p1512_p1, %p1506_p9 }
  0x3d   : > { %1516 = shalt.err (!%p1513_p4)
}
  0x3e   : > { %1366 = dma.hbm_to_vmem [thread:$0]  (!%p1748_p11), %s2058_s3, 256, %s1752_s14, [#allocation9], %s1637_s10, %s1637_s10, %s1638_s13  }
  0x3f   : > { %s35_s16 = sadd.s32 1, %s1629_s25  ;;  %s42_s17 = sadd.s32 1, %s1621_s23 }
  0x40   : > { %p37_p13 = scmp.ge.s32.totalorder %s35_s16, 2  ;;  %p49_p6 = scmp.ne.s32.totalorder %s1621_s23, %s1617_s22 }
  0x41   : > { %p50_p10 = scmp.eq.s32.totalorder %s1633_s26, 0  ;;  %p1377_p3 = scmp.lt.s32.totalorder %s1633_s26, 2 }
  0x42   : > { %s2088_s16 = smov (%p37_p13, %s35_s16), 0  ;;  %p1816_p7 = por %p1721_p2, %p49_p6 }
  0x43   : > { %p51_p5 = por %p50_p10, %p49_p6  ;;  %s39_s18 = ssub.s32 %s1629_s25, %s2088_s16 }
  0x44   : > { %s2074_s12 = scalar_select %p1816_p7, 1, 0 }
  0x45   : > { %s249_s19 = sand.u32 1, %s1621_s23   ;;  %p40_p9 = scmp.eq.s32.totalorder %s39_s18, 0 }
  0x46   : > { %s1208_s14 = sshll.u32 %s249_s19, 2  ;;  %s1209_s10 = sshll.u32 %s1629_s25, 6 }
  0x47   : > { %s1825_s13 = scalar_select %p40_p9, %s1621_s23, %s42_s17  }
  0x48   : > { %s1830_s28 = scalar_lea.hbm %s2055_s0, %s1209_s10  ;;  %s253_s30 = scalar_lea.vmem [#allocation5], %s1208_s14 }
  0x49   : > { %s260_s11 = sshll.u32 %s253_s30, 4  ;;  %p1834_p2 = pnand %p1377_p3, %p51_p5  ;;  %s1838_s11 = int_to_ptr.vmem [resolvable:$true] %s260_s11 }
  0x4a   : > { %s250_s15 = scalar_lea.sflag [#allocation6], %s249_s19  ;;  %s1517_s17 = scalar_lea.hbm %s1830_s28, 64 }
  0x4b   : > { %p1518_p11 = scmp.ne.s32.totalorder %s1830_s28, %s1517_s17  ;;  %p1519_p12 = pneg %p1834_p2 }
  0x4c   : > { %s1522_s10 = scalar_lea.hbm %s2055_s0, 128  ;;  %p1523_p4 = scmp.lt.u32.totalorder %s1830_s28, %s2055_s0 }
  0x4d   : > { %p1520_p0 = pnand %p1519_p12, %p1518_p11  ;;  %p1524_p13 = scmp.lt.u32.totalorder %s1522_s10, %s1517_s17 }
  0x4e   : > { %p1526_p10 = scmp.lt.u32.totalorder %s1517_s17, %s1830_s28 }
  0x4f   : > { %p1521_p1 = pneg %p1520_p0  ;;  %p1525_p6 = por %p1524_p13, %p1523_p4 }
  0x51   : > { %p1527_p3 = por %p1526_p10, %p1525_p6 }
  0x53   : > { %p1528_p5 = pnand %p1527_p3, %p1521_p1 }
  0x55   : > { %1531 = shalt.err (!%p1528_p5)
}
  0x56   : > { %s1532_s19 = scalar_lea.vmem %s1838_s11, 64  ;;  %s1639_s30 = smov [#allocation5]  }
  0x57   : > { %p1533_p9 = scmp.ne.s32.totalorder %s1838_s11, %s1532_s19  ;;  %s1537_s18 = sshll.u32 %s1639_s30, 4  ;;  %s1538_s18 = int_to_ptr.vmem [resolvable:$false] %s1537_s18 }
  0x58   : > { %s1539_s14 = scalar_lea.vmem %s1538_s18, 128  ;;  %p1540_p7 = scmp.lt.s32.totalorder %s1838_s11, %s1538_s18 }
  0x59   : > { %p1535_p11 = pnand %p1533_p9, %p1519_p12  ;;  %p1541_p4 = scmp.lt.s32.totalorder %s1539_s14, %s1532_s19 }
  0x5b   : > { %p1536_p0 = pneg %p1535_p11  ;;  %p1542_p13 = por %p1541_p4, %p1540_p7 }
  0x5d   : > { %p1543_p6 = pnand %p1542_p13, %p1536_p0 }
  0x5f   : > { %1546 = shalt.err (!%p1543_p6)
}
  0x60   : > { %1370 = dma.hbm_to_vmem [thread:$0]  (!%p1834_p2), %s1830_s28, 64, %s1838_s11, %s250_s15  }
  0x61   : > { %275 = sbr.rel (%p1737_p8) target bundleno = 2846 (0xb1e), region = 44  ;;  %s1868_s17 = sand.u32 (!%p1737_p8), 1, %s1617_s22  }
  0x62   : > { %s1211_s10 = sshll.u32 (!%p1737_p8), %s1868_s17, 2  ;;  %s278_s20 = scalar_lea.sflag (!%p1737_p8), [#allocation6], %s1868_s17 }
  0x63   : > { %s281_s27 = scalar_lea.vmem (!%p1737_p8), [#allocation5], %s1211_s10  ;;  %p2076_p7 = scmp.ne.s32.totalorder (!%p1737_p8), %s2069_s7, 0 }
  0x68   : > { %1600 = dma.done.wait (%p2076_p7), %s278_s20, 64  }
  0x69   : > { %1602 = vsyncadd (%p2076_p7), %s278_s20, 4294967232  ;;  %p2077_p12 = scmp.ne.s32.totalorder %s2067_s29, 0 }
  0x6b   : > { %1604 = dma.done.wait (%p2077_p12), [#allocation9], 512  }
  0x6c   : > { %1606 = vsyncadd (%p2077_p12), [#allocation9], 4294966784  ;;  %v1640_v0 = vmov 0.0   ;;  %vm1641_vm0 = vmmov 0   ;;  %v1440_v1 = vld [vmem:[#allocation8] sm:$0xff]   ;;  %v1441_v2 = vld [vmem:[#allocation8 + $0x8] sm:$0xff]   ;;  %v428_v22 = vlaneseq }
  0x6d   : > { %1268 = vmatprep.subr.bf16.mxu0 %v1640_v0  ;;  %1272 = vmatprep.mubr.msk.bf16.mxu0 %vm1641_vm0, %v1640_v0  ;;  %v329_v3 = vld [vmem:[%s281_s27] sm:$0xf]  ;;  %vm353_vm1 = vcmask 261120   ;;  %v1215_v4 = vld [vmem:[%s2057_s2] ss:$0 sm:$0xff]  ;;  %vm399_vm2 = vcmask 257024  }
  0x6e   : > { %1276 = vmatprep.subr.bf16.mxu1 %v1640_v0  ;;  %1278 = vmatprep.mubr.msk.bf16.mxu1 %vm1641_vm0, %v1640_v0  ;;  %s1642_s9 = smov 96   ;;  %s1643_s28 = smov 120   ;;  %vm433_vm3 = vcmask 64512   ;;  %v429_v23 = vshrl.u32 %v428_v22, 7  ;;  %vm495_vm4 = vcmask 1043456  }
  0x6f   : > { %1269 = vmatpush3.bf16.msra.mxu0 %v1440_v1  ;;  %p321_p8 = scmp.lt.s32.totalorder %s1625_s24, 1  ;;  %s1644_s30 = smov 64   ;;  %v424_v58 = vld [vmem:[#allocation10 + $0x4] sm:$0xf]  ;;  %v423_v1 = vld [vmem:[#allocation10] sm:$0xf] }
  0x70   : > { %1270 = vmatprep.subr.bf16.mxu0 %v1640_v0  ;;  %v430_v26 = vsub.s32 0, %v429_v23  ;;  %s1645_s18 = smov 112   ;;  %v664_v59 = vsel %vm495_vm4, %v424_v58, 0  ;;  %s1646_s14 = smov 104  }
  0x71   : > { %s322_s11 = scalar_select %p321_p8, %s1625_s24, 1 }
  0x72   : > { %s1214_s10 = sshll.u32 %s1868_s17, 3  ;;  %s1237_s29 = sshll.u32 %s1625_s24, 7 }
  0x73   : > { %1271 = vmatpush3.bf16.msra.mxu0 %v1441_v2  ;;  %s323_s19 = scalar_lea.vmem %s2060_s5, %s322_s11  ;;  %s320_s7 = scalar_lea.vmem [#allocation11], %s1214_s10 }
  0x74   : > { %1282 = vmatprep.subr.bf16.mxu0 %v1640_v0  ;;  %v413_v24 = vld [vmem:[%s323_s19] sm:$0x1]  ;;  %s2005_s8 = scalar_lea.hbm %s2061_s6, %s1237_s29  ;;  %s1079_s24 = scalar_lea.sflag [#allocation7], %s1868_s17 }
  0x75   : > { %v414_v25 = vmul.f32 -10000.0, %v413_v24  ;;  %p2078_p1 = scmp.ne.s32.totalorder %s2074_s12, 0  ;;  %s1647_s19 = smov [#allocation11]  }
  0x76   : > { %1273 = vmatmul.mubr.msk.bf16.vlgmr.msra.gmra.mrb[0].mxu0 %vm353_vm1, %v329_v3 }
  0x77   : > { %1284 = vmatprep.mubr.msk.bf16.mxu0 %vm1641_vm0, %v1640_v0  ;;  %v1919_v27 = vrot.slane %v414_v25, %v430_v26 }
 0x149   : > { %v391_v5 = vpop.f32.mrb[0].mxu0 }
 0x14a   : > { %v392_v6 = vadd.f32 %v1215_v4, %v391_v5  ;;  %v1274_v7 = vpop.f32.mrb[1].mxu0  ;;  %v710_v4 = vsel %vm495_vm4, %v423_v1, 0 }
 0x14b   : > { %v394_v8 = vpop.f32.mrb[2].mxu0 }
 0x14c   : > { %v397_v9 = vmul.f32 0.35355338, %v392_v6  ;;  %v1275_v10 = vpop.f32.mrb[3].mxu0  ;;  %v1240_v11 = vpack.c.bf16 %v392_v6, %v392_v6 }
 0x14e   : > { %v398_v12 = vpack.c.bf16 %v397_v9, %v397_v9  ;;  %405 = vrot.lane.b32.xlu0 %v1240_v11, %s1642_s9  ;;  %s1093_s9 = sshll.u32 %s320_s7, 4  ;;  %s2007_s9 = int_to_ptr.vmem [resolvable:$true] %s1093_s9 }
 0x14f   : > { %s1547_s15 = scalar_lea.vmem %s2007_s9, 128 }
 0x150   : > { %400 = vst.msk [vmem:[#allocation2] sm:$0xf] %vm399_vm2, %v398_v12  ;;  %p1548_p2 = scmp.ne.s32.totalorder %s2007_s9, %s1547_s15 }
 0x152   : > { %p1549_p10 = pnand %p1548_p2, %p2078_p1 }
 0x154   : > { %p1550_p3 = pneg %p1549_p10 }
 0x157   : > { %v420_v13 = vld [vmem:[#allocation2] sm:$0xf] }
 0x158   : > { %v1895_v14 = vcombine.low %v420_v13, %v420_v13 }
 0x15a   : > { %543 = vrot.lane.b32.xlu1 %v1895_v14, %s1643_s28 }
 0x1c0   : > { %v406_v15 = vpop.permute.xlu0 %405 }
 0x1c1   : > { %408 = vst.msk [vmem:[#allocation3] sm:$0xf] %vm399_vm2, %v406_v15 }
 0x1c8   : > { %v421_v16 = vld [vmem:[#allocation3] sm:$0xf] }
 0x1c9   : > { %v438_v17 = vsel %vm433_vm3, %v421_v16, 0  ;;  %v1901_v18 = vcombine.low %v421_v16, %v421_v16 }
 0x1ca   : > { %1277 = vmatpush3.bf16.xpose.msra.mxu1 %v438_v17 }
 0x1cb   : > { %548 = vrot.lane.b32.xlu0 %v1901_v18, %s1643_s28  ;;  %1288 = vmatprep.subr.bf16.mxu1 %v1640_v0 }
 0x1cc   : > { %v544_v21 = vpop.permute.xlu1 %543 }
 0x1d1   : > { %1279 = vmatmul.mubr.msk.bf16.vlgmr.msra.gmra.mrb[0].mxu1 %vm433_vm3, %v420_v13 }
 0x1d2   : > { %1290 = vmatprep.mubr.msk.bf16.mxu1 %vm1641_vm0, %v1640_v0 }
 0x23d   : > { %v549_v19 = vpop.permute.xlu0 %548 }
 0x23e   : > { %v554_v20 = vsel %vm433_vm3, %v549_v19, 0 }
 0x23f   : > { %1289 = vmatpush3.bf16.xpose.msra.mxu1 %v554_v20 }
 0x240   : > { %1300 = vmatprep.subr.bf16.mxu1 %v1640_v0 }
 0x246   : > { %1291 = vmatmul.mubr.msk.bf16.vlgmr.msra.gmra.mrb[4].mxu1 %vm433_vm3, %v544_v21 }
 0x247   : > { %1302 = vmatprep.mubr.msk.bf16.mxu1 %vm1641_vm0, %v1640_v0  ;;  %1301 = vmatpush3.bf16.msra.mxu1 %v664_v59 }
 0x248   : > { %1312 = vmatprep.subr.bf16.mxu1 %v1640_v0 }
 0x2a4   : > { %v474_v28 = vpop.f32.mrb[0].mxu1 }
 0x2a5   : > { %v475_v29 = vadd.f32 %v474_v28, %v1919_v27  ;;  %v1280_v30 = vpop.f32.mrb[1].mxu1 }
 0x2a6   : > { %v477_v31 = vpop.f32.mrb[2].mxu1 }
 0x2a7   : > { %v1281_v32 = vpop.f32.mrb[3].mxu1  ;;  %v480_v33 = vsel %vm433_vm3, %v475_v29, -inf }
 0x2a8   : > { %481 = vmax.xlane.f32.xlu1 %v480_v33 }
 0x319   : > { %v590_v34 = vpop.f32.mrb[4].mxu1 }
 0x31a   : > { %v591_v35 = vadd.f32 %v590_v34, %v1919_v27  ;;  %v1292_v36 = vpop.f32.mrb[5].mxu1 }
 0x31b   : > { %v593_v37 = vpop.f32.mrb[6].mxu1 }
 0x31c   : > { %v1293_v38 = vpop.f32.mrb[7].mxu1  ;;  %v596_v39 = vsel %vm433_vm3, %v591_v35, -inf }
 0x31d   : > { %597 = vmax.xlane.f32.xlu0 %v596_v39 }
 0x333   : > { %409 = vrot.lane.b32.xlu0 %v1240_v11, %s1644_s30  ;;  %s1551_s30 = sshll.u32 %s1647_s19, 4  ;;  %s1552_s30 = int_to_ptr.vmem [resolvable:$false] %s1551_s30 }
 0x334   : > { %p1554_p5 = scmp.lt.s32.totalorder %s2007_s9, %s1552_s30 }
 0x335   : > { %v482_v40 = vpop.xlane.xlu1 %481 }
 0x336   : > { %v483_v41 = vsub.f32 %v475_v29, %v482_v40 }
 0x337   : > { %754 = vrot.lane.b32.xlu0 %v1901_v18, %s1645_s18 }
 0x338   : > { %v484_v42 = vmul.f32 1.442695, %v483_v41 }
 0x33a   : > { %1445 = vpow2.f32 %v484_v42 }
 0x33b   : > { %752 = vrot.lane.b32.xlu0 %v1895_v14, %s1645_s18 }
 0x344   : > { %v1446_v43 = vpop.eup %1445 }
 0x345   : > { %v486_v44 = vsel %vm433_vm3, %v1446_v43, 0.0 }
 0x346   : > { %487 = vadd.xlane.f32.xlu1 %v486_v44 }
 0x3aa   : > { %v598_v45 = vpop.xlane.xlu0 %597 }
 0x3ab   : > { %v599_v46 = vsub.f32 %v591_v35, %v598_v45 }
 0x3ad   : > { %v600_v47 = vmul.f32 1.442695, %v599_v46 }
 0x3ae   : > { %v410_v48 = vpop.permute.xlu0 %409 }
 0x3af   : > { %1447 = vpow2.f32 %v600_v47  ;;  %412 = vst.msk [vmem:[#allocation4] sm:$0xf] %vm399_vm2, %v410_v48  ;;  %v425_v48 = vld [vmem:[#allocation10 + $0x8] sm:$0xf] }
 0x3b2   : > { %v755_v10 = vpop.permute.xlu0 %754 }
 0x3b3   : > { %v760_v16 = vsel %vm433_vm3, %v755_v10, 0 }
 0x3b6   : > { %v422_v49 = vld [vmem:[#allocation4] sm:$0xf]  ;;  %v753_v19 = vpop.permute.xlu0 %752 }
 0x3b7   : > { %v497_v50 = vsel %vm495_vm4, %v422_v49, 0  ;;  %v1934_v53 = vcombine.low %v422_v49, %v422_v49  ;;  %v867_v49 = vsel %vm495_vm4, %v425_v48, 0 }
 0x3b8   : > { %1283 = vmatpush3.bf16.msra.mxu0 %v497_v50 }
 0x3b9   : > { %v1448_v51 = vpop.eup %1447  ;;  %1294 = vmatprep.subr.bf16.mxu0 %v1640_v0 }
 0x3ba   : > { %v602_v52 = vsel %vm433_vm3, %v1448_v51, 0.0 }
 0x3bb   : > { %603 = vadd.xlane.f32.xlu1 %v602_v52 }
 0x3cc   : > { %611 = vrot.lane.b32.xlu1 %v1934_v53, %s1643_s28 }
 0x3d3   : > { %v488_v54 = vpop.xlane.xlu1 %487 }
 0x3d4   : > { %1449 = vrcp.f32 %v488_v54 }
 0x3de   : > { %v1450_v55 = vpop.eup %1449 }
 0x3df   : > { %v490_v56 = vmul.f32 %v1450_v55, %v1446_v43 }
 0x3e1   : > { %v491_v57 = vpack.c.bf16 %v490_v56, %v490_v56 }
 0x3e3   : > { %1285 = vmatmul.mubr.msk.bf16.vlgmr.msra.gmra.mrb[4].mxu0 %vm433_vm3, %v491_v57 }
 0x3e4   : > { %1296 = vmatprep.mubr.msk.bf16.mxu0 %vm1641_vm0, %v1640_v0 }
 0x448   : > { %v604_v60 = vpop.xlane.xlu1 %603 }
 0x449   : > { %1451 = vrcp.f32 %v604_v60 }
 0x44c   : > { %v612_v61 = vpop.permute.xlu1 %611 }
 0x44d   : > { %v617_v62 = vsel %vm495_vm4, %v612_v61, 0 }
 0x44e   : > { %1295 = vmatpush3.bf16.msra.mxu0 %v617_v62 }
 0x44f   : > { %1306 = vmatprep.subr.bf16.mxu0 %v1640_v0 }
 0x453   : > { %v1452_v63 = vpop.eup %1451 }
 0x454   : > { %v606_v2 = vmul.f32 %v1452_v63, %v1448_v51 }
 0x456   : > { %v607_v3 = vpack.c.bf16 %v606_v2, %v606_v2 }
 0x458   : > { %1297 = vmatmul.mubr.msk.bf16.vlgmr.msra.gmra.mrb[8].mxu0 %vm433_vm3, %v607_v3 }
 0x459   : > { %1307 = vmatpush3.bf16.msra.mxu0 %v710_v4  ;;  %1308 = vmatprep.mubr.msk.bf16.mxu0 %vm1641_vm0, %v1640_v0  ;;  %v426_v4 = vld [vmem:[#allocation10 + $0xc] sm:$0xf] }
 0x45a   : > { %1318 = vmatprep.subr.bf16.mxu0 %v1640_v0 }
 0x4b6   : > { %v533_v5 = vpop.f32.mrb[4].mxu0 }
 0x4b7   : > { %v539_v6 = vpack.c.bf16 %v533_v5, %v533_v5  ;;  %v1286_v7 = vpop.f32.mrb[5].mxu0  ;;  %v1025_v5 = vsel %vm495_vm4, %v426_v4, 0 }
 0x4b8   : > { %v536_v8 = vpop.f32.mrb[6].mxu0 }
 0x4b9   : > { %v1287_v9 = vpop.f32.mrb[7].mxu0  ;;  %1309 = vmatmul.mubr.msk.bf16.vlgmr.msra.gmra.mrb[12].mxu0 %vm433_vm3, %v539_v6 }
 0x4ba   : > { %1320 = vmatprep.mubr.msk.bf16.mxu0 %vm1641_vm0, %v1640_v0 }
 0x52b   : > { %v653_v11 = vpop.f32.mrb[8].mxu0 }
 0x52c   : > { %v659_v12 = vpack.c.bf16 %v653_v11, %v653_v11  ;;  %v1298_v13 = vpop.f32.mrb[9].mxu0 }
 0x52d   : > { %v656_v15 = vpop.f32.mrb[10].mxu0 }
 0x52e   : > { %v1299_v17 = vpop.f32.mrb[11].mxu0  ;;  %1303 = vmatmul.mubr.msk.bf16.vlgmr.msra.gmra.mrb[8].mxu1 %vm433_vm3, %v659_v12 }
 0x52f   : > { %1313 = vmatpush3.bf16.xpose.msra.mxu1 %v760_v16  ;;  %1314 = vmatprep.mubr.msk.bf16.mxu1 %vm1641_vm0, %v1640_v0 }
 0x530   : > { %1324 = vmatprep.subr.bf16.mxu1 %v1640_v0 }
 0x536   : > { %1315 = vmatmul.mubr.msk.bf16.vlgmr.msra.gmra.mrb[12].mxu1 %vm433_vm3, %v753_v19 }
 0x537   : > { %1326 = vmatprep.mubr.msk.bf16.mxu1 %vm1641_vm0, %v1640_v0  ;;  %1325 = vmatpush3.bf16.msra.mxu1 %v867_v49 }
 0x538   : > { %1336 = vmatprep.subr.bf16.mxu1 %v1640_v0 }
 0x58c   : > { %v746_v20 = vpop.f32.mrb[12].mxu0 }
 0x58d   : > { %v1310_v21 = vpop.f32.mrb[13].mxu0 }
 0x58e   : > { %v749_v22 = vpop.f32.mrb[14].mxu0 }
 0x58f   : > { %v1311_v23 = vpop.f32.mrb[15].mxu0  ;;  %v1235_v22 = vld [vmem:[%s2059_s4] ss:$0 sm:$0xff] }
 0x601   : > { %v700_v24 = vpop.f32.mrb[8].mxu1 }
 0x602   : > { %v1961_v25 = vadd.f32 %v746_v20, %v700_v24  ;;  %v1304_v26 = vpop.f32.mrb[9].mxu1 }
 0x603   : > { %v703_v28 = vpop.f32.mrb[10].mxu1 }
 0x604   : > { %v1305_v29 = vpop.f32.mrb[11].mxu1 }
 0x609   : > { %v796_v30 = vpop.f32.mrb[12].mxu1 }
 0x60a   : > { %v797_v31 = vadd.f32 %v796_v30, %v1919_v27  ;;  %v1316_v32 = vpop.f32.mrb[13].mxu1 }
 0x60b   : > { %v799_v33 = vpop.f32.mrb[14].mxu1 }
 0x60c   : > { %v1317_v34 = vpop.f32.mrb[15].mxu1  ;;  %v802_v35 = vsel %vm433_vm3, %v797_v31, -inf }
 0x60d   : > { %803 = vmax.xlane.f32.xlu1 %v802_v35 }
 0x61e   : > { %912 = vrot.lane.b32.xlu1 %v1901_v18, %s1646_s14 }
 0x622   : > { %910 = vrot.lane.b32.xlu1 %v1895_v14, %s1646_s14 }
 0x69a   : > { %v804_v36 = vpop.xlane.xlu1 %803 }
 0x69b   : > { %v805_v37 = vsub.f32 %v797_v31, %v804_v36 }
 0x69d   : > { %v806_v38 = vmul.f32 1.442695, %v805_v37 }
 0x69e   : > { %v913_v44 = vpop.permute.xlu1 %912 }
 0x69f   : > { %1453 = vpow2.f32 %v806_v38  ;;  %v918_v46 = vsel %vm433_vm3, %v913_v44, 0 }
 0x6a2   : > { %v911_v47 = vpop.permute.xlu1 %910 }
 0x6a9   : > { %v1454_v39 = vpop.eup %1453 }
 0x6aa   : > { %v808_v40 = vsel %vm433_vm3, %v1454_v39, 0.0 }
 0x6ab   : > { %809 = vadd.xlane.f32.xlu0 %v808_v40 }
 0x6c1   : > { %814 = vrot.lane.b32.xlu0 %v1934_v53, %s1645_s18  ;;  %s1553_s18 = scalar_lea.vmem %s1552_s30, 256 }
 0x6c2   : > { %p1555_p9 = scmp.lt.s32.totalorder %s1553_s18, %s1547_s15 }
 0x6c4   : > { %p1556_p11 = por %p1555_p9, %p1554_p5 }
 0x6c6   : > { %p1557_p0 = pnand %p1556_p11, %p1550_p3 }
 0x738   : > { %v810_v41 = vpop.xlane.xlu0 %809 }
 0x739   : > { %1455 = vrcp.f32 %v810_v41 }
 0x73c   : > { %v815_v42 = vpop.permute.xlu0 %814 }
 0x73d   : > { %v820_v43 = vsel %vm495_vm4, %v815_v42, 0 }
 0x73e   : > { %1319 = vmatpush3.bf16.msra.mxu0 %v820_v43 }
 0x73f   : > { %1330 = vmatprep.subr.bf16.mxu0 %v1640_v0 }
 0x743   : > { %v1456_v14 = vpop.eup %1455 }
 0x744   : > { %v812_v18 = vmul.f32 %v1456_v14, %v1454_v39 }
 0x746   : > { %v813_v45 = vpack.c.bf16 %v812_v18, %v812_v18 }
 0x748   : > { %1321 = vmatmul.mubr.msk.bf16.vlgmr.msra.gmra.mrb[16].mxu0 %vm433_vm3, %v813_v45 }
 0x749   : > { %1331 = vmatpush3.bf16.xpose.msra.mxu0 %v918_v46  ;;  %1332 = vmatprep.mubr.msk.bf16.mxu0 %vm1641_vm0, %v1640_v0 }
 0x74a   : > { %1342 = vmatprep.subr.bf16.mxu0 %v1640_v0 }
 0x750   : > { %1333 = vmatmul.mubr.msk.bf16.vlgmr.msra.gmra.mrb[20].mxu0 %vm433_vm3, %v911_v47 }
 0x751   : > { %1344 = vmatprep.mubr.msk.bf16.mxu0 %vm1641_vm0, %v1640_v0  ;;  %1343 = vmatpush3.bf16.msra.mxu0 %v1025_v5 }
 0x81b   : > { %v856_v50 = vpop.f32.mrb[16].mxu0 }
 0x81c   : > { %v862_v51 = vpack.c.bf16 %v856_v50, %v856_v50  ;;  %v1322_v52 = vpop.f32.mrb[17].mxu0 }
 0x81d   : > { %v859_v54 = vpop.f32.mrb[18].mxu0 }
 0x81e   : > { %v1323_v55 = vpop.f32.mrb[19].mxu0  ;;  %1327 = vmatmul.mubr.msk.bf16.vlgmr.msra.gmra.mrb[16].mxu1 %vm433_vm3, %v862_v51 }
 0x81f   : > { %1338 = vmatprep.mubr.msk.bf16.mxu1 %vm1641_vm0, %v1640_v0 }
 0x823   : > { %v954_v56 = vpop.f32.mrb[20].mxu0 }
 0x824   : > { %v955_v57 = vadd.f32 %v954_v56, %v1919_v27  ;;  %v1334_v58 = vpop.f32.mrb[21].mxu0 }
 0x825   : > { %v957_v59 = vpop.f32.mrb[22].mxu0 }
 0x826   : > { %v1335_v60 = vpop.f32.mrb[23].mxu0  ;;  %v960_v61 = vsel %vm433_vm3, %v955_v57, -inf }
 0x827   : > { %961 = vmax.xlane.f32.xlu0 %v960_v61 }
 0x83d   : > { %972 = vrot.lane.b32.xlu0 %v1934_v53, %s1646_s14 }
 0x8b4   : > { %v962_v62 = vpop.xlane.xlu0 %961 }
 0x8b5   : > { %v963_v63 = vsub.f32 %v955_v57, %v962_v62 }
 0x8b7   : > { %v964_v1 = vmul.f32 1.442695, %v963_v63 }
 0x8b8   : > { %v973_v2 = vpop.permute.xlu0 %972 }
 0x8b9   : > { %1457 = vpow2.f32 %v964_v1  ;;  %v978_v3 = vsel %vm495_vm4, %v973_v2, 0 }
 0x8ba   : > { %1337 = vmatpush3.bf16.msra.mxu1 %v978_v3 }
 0x8c3   : > { %v1458_v0 = vpop.eup %1457 }
 0x8c4   : > { %v966_v27 = vsel %vm433_vm3, %v1458_v0, 0.0 }
 0x8c5   : > { %967 = vadd.xlane.f32.xlu1 %v966_v27 }
 0x8f1   : > { %v903_v6 = vpop.f32.mrb[16].mxu1 }
 0x8f2   : > { %v909_v7 = vadd.f32 %v903_v6, %v1961_v25  ;;  %v1328_v53 = vpop.f32.mrb[17].mxu1 }
 0x8f3   : > { %v906_v8 = vpop.f32.mrb[18].mxu1 }
 0x8f4   : > { %v1329_v9 = vpop.f32.mrb[19].mxu1 }
 0x952   : > { %v968_v10 = vpop.xlane.xlu1 %967 }
 0x953   : > { %1459 = vrcp.f32 %v968_v10 }
 0x95d   : > { %v1460_v11 = vpop.eup %1459 }
 0x95e   : > { %v970_v12 = vmul.f32 %v1460_v11, %v1458_v0 }
 0x960   : > { %v971_v13 = vpack.c.bf16 %v970_v12, %v970_v12 }
 0x962   : > { %1339 = vmatmul.mubr.msk.bf16.vlgmr.msra.gmra.mrb[20].mxu1 %vm433_vm3, %v971_v13 }
 0xa35   : > { %v1014_v15 = vpop.f32.mrb[20].mxu1 }
 0xa36   : > { %v1020_v16 = vpack.c.bf16 %v1014_v15, %v1014_v15  ;;  %v1340_v17 = vpop.f32.mrb[21].mxu1 }
 0xa37   : > { %v1017_v19 = vpop.f32.mrb[22].mxu1 }
 0xa38   : > { %v1341_v20 = vpop.f32.mrb[23].mxu1  ;;  %1345 = vmatmul.mubr.msk.bf16.vlgmr.msra.gmra.mrb[24].mxu0 %vm433_vm3, %v1020_v16 }
 0xb0b   : > { %v1061_v21 = vpop.f32.mrb[24].mxu0 }
 0xb0c   : > { %v1067_v23 = vadd.f32 %v1061_v21, %v909_v7  ;;  %v1346_v24 = vpop.f32.mrb[25].mxu0 }
 0xb0d   : > { %v1064_v25 = vpop.f32.mrb[26].mxu0 }
 0xb0e   : > { %v1075_v26 = vadd.f32 %v1235_v22, %v1067_v23  ;;  %v1347_v28 = vpop.f32.mrb[27].mxu0 }
 0xb10   : > { %1077 = vst.msk [vmem:[%s320_s7] sm:$0xff] %vm353_vm1, %v1075_v26 }
 0xb11   : > { %1560 = shalt.err (!%p1557_p0)
}
 0xb12   : > { %s1561_s17 = scalar_lea.hbm %s2005_s8, 128  ;;  %s1565_s20 = scalar_lea.hbm %s2061_s6, 256 }
 0xb13   : > { %p1562_p4 = scmp.ne.s32.totalorder %s2005_s8, %s1561_s17  ;;  %p1566_p7 = scmp.lt.u32.totalorder %s2005_s8, %s2061_s6 }
 0xb14   : > { %p1567_p12 = scmp.lt.u32.totalorder %s1565_s20, %s1561_s17  ;;  %p1569_p2 = scmp.lt.u32.totalorder %s1561_s17, %s2005_s8 }
 0xb15   : > { %p1563_p13 = pnand %p1562_p4, %p2078_p1 }
 0xb16   : > { %p1568_p8 = por %p1567_p12, %p1566_p7 }
 0xb17   : > { %p1564_p6 = pneg %p1563_p13 }
 0xb18   : > { %p1570_p10 = por %p1569_p2, %p1568_p8 }
 0xb1a   : > { %p1571_p3 = pnand %p1570_p10, %p1564_p6 }
 0xb1c   : > { %1574 = shalt.err (!%p1571_p3)
}
 0xb1d   : > { %1358 = dma.vmem_to_hbm [thread:$0]  (%p2078_p1), %s2007_s9, 128, %s2005_s8, %s1079_s24  }
 0xb1e PF: > { %s2079_s7 = sld [smem:[#allocation15_spill]]  ;;  %s1105_s28 = sand.u32 1, %s1613_s21  }
 0xb1f   : > { %p2081_p9 = scmp.ge.s32.totalorder %s1633_s26, 2  ;;  %s1106_s11 = scalar_lea.sflag [#allocation7], %s1105_s28 }
 0xb24   : > { %p2080_p5 = scmp.ne.s32.totalorder %s2079_s7, 0 }
 0xb26   : > { %p1372_p11 = pnand %p2081_p9, %p2080_p5 }
 0xb28   : > { %1608 = dma.done.wait (!%p1372_p11), %s1106_s11, 128  }
 0xb29   : > { %1610 = vsyncadd (!%p1372_p11), %s1106_s11, 4294967168  ;;  %s23_s26 = sadd.s32 1, %s1633_s26   ;;  %s2082_s21 = smov %s1617_s22 }
 0xb2a   : > { %p20_p0 = scmp.ge.s32.totalorder %s23_s26, 4   ;;  %s2083_s22 = smov %s1621_s23 }
 0xb2b   : > { %s2084_s23 = smov %s1825_s13  ;;  %s2085_s24 = smov %s1629_s25 }
 0xb2c   : > { %s2086_s25 = smov %s2088_s16  ;;  %22 = sbr.rel (!%p20_p0) target bundleno = 7 (0x7), region = 105 }
 0xb33   :  { %1111 = vsyncpa [#allocation6], 1 }
 0xb34   :  { %1113 = vsyncpa [#allocation6 + $0x1], 1 }
 0xb35   :  { %1114 = vsyncpa [#allocation9], 1 }
 0xb36   :  { %1115 = vsyncpa [#allocation7], 1 }
 0xb37   :  { %1117 = vsyncpa [#allocation7 + $0x1], 1 }

</bundles_post_ra>
